<compile_context>
chip_gen: v7x
topology: tpu7x:2x2x1
jax: 0.10.0
libtpu: 0.0.40
codegen_flags: <defaults>
</compile_context>

<pallas_src>
import math

import jax
import jax.numpy as jnp
from jax.experimental import pallas as pl
from jax.experimental.pallas import tpu as pltpu

BN_EPS = 1e-5
LEAKY_SLOPE = 0.01                     # nn.LeakyReLU() default


def _vmem_limit_bytes():
    """Generation-aware scoped-VMEM limit (~3/4 of physical), safe fallback."""
    try:
        cap = int(pltpu.get_tpu_info().vmem_capacity_bytes)
        return max(32 * 1024 * 1024, min(3 * cap // 4, 112 * 1024 * 1024))
    except Exception:
        return 48 * 1024 * 1024        # fits scoped VMEM on v5e / v6e / v7x


def _pick_td(D, H, WpC, WCp, kH, budget_bytes, max_rows=2048):
    """Largest depth-chunk TD (divisor of D, TD*H % 8 == 0) that fits the budget."""
    divisors = [t for t in range(D, 0, -1) if D % t == 0]
    ok = [t for t in divisors if (t * H) % 8 == 0] or divisors
    for t in ok:                       # largest first
        rows = t * H
        est = (2 * rows * WCp * 2      # double-buffered bf16 y block
               + rows * WCp * 4        # f32 accumulator
               + rows * kH * WpC * 2)  # folded-K bf16 matmul operand
        if rows <= max_rows and est <= budget_bytes:
            return t
    return ok[-1]


def _pick_tr(R, WCp, vmem_limit):
    """Pass-2 row tile: largest divisor of R (mult. of 8) within a few MiB."""
    max_rows = max(8, min(2048, (vmem_limit // 8) // max(WCp * 2, 1)))
    max_rows -= max_rows % 8
    best = None
    for t in range(1, R + 1):
        if R % t == 0 and (t % 8 == 0 or t == R) and t <= max_rows:
            best = t
    return best if best is not None else R


def _make_conv_stats_kernel(kD, kH, TD, H, WpC, WCp):
    """Pass 1: conv (kH folded into K) + per-sample BN sum / sum-of-squares."""
    TDH = TD * H
    K = kH * WpC

    def kernel(x_ref, w_ref, y_ref, stats_ref):
        # x_ref    : (Dp, Hp, Wp*Cin) bf16 padded slab for this sample
        # w_ref    : (kD, kH*Wp*Cin, W*Coutp) bf16 Toeplitz-along-W weight
        # y_ref    : (TD*H, W*Coutp)  bf16 conv output block (lane-dense)
        # stats_ref: (2, W*Coutp)     f32 per-sample partial stats accumulator
        c = pl.program_id(1)

        @pl.when(c == 0)
        def _init():
            stats_ref[...] = jnp.zeros_like(stats_ref)

        d0 = pl.multiple_of(c * TD, TD)
        acc = jnp.zeros((TDH, WCp), jnp.float32)
        for i in range(kD):
            # one hoisted band load per kd tap (depth is the untiled axis)
            band = x_ref[pl.ds(d0 + i, TD), :, :]                  # (TD, Hp, WpC)
            # fold the kH taps into the contraction: K = kH * Wp * Cin
            a = jnp.concatenate([band[:, j:j + H, :] for j in range(kH)],
                                axis=2)                            # (TD, H, K)
            acc = acc + jnp.dot(a.reshape(TDH, K), w_ref[i],
                                preferred_element_type=jnp.float32)

        # bf16 intermediate store (stats below use the f32 accumulator)
        y_ref[...] = acc.astype(y_ref.dtype)

        # single-pass BN statistics, accumulated across depth chunks
        stats_ref[...] = stats_ref[...] + jnp.concatenate(
            [jnp.sum(acc, axis=0, keepdims=True),
             jnp.sum(acc * acc, axis=0, keepdims=True)], axis=0)

    return kernel


def _norm_act_kernel(y_ref, scale_ref, shift_ref, o_ref):
    """Pass 2: folded BN affine (y*scale + shift) -> LeakyReLU; fully parallel."""
    yh = y_ref[...].astype(jnp.float32) * scale_ref[...] + shift_ref[...]
    o_ref[...] = jnp.where(yh >= 0, yh, LEAKY_SLOPE * yh).astype(o_ref.dtype)
    # TODO(synk): Dropout3d with p>0 (channel-wise dropout) not implemented;
    # the module default p=0 is the identity in both train and eval.


def unit_conv_forward(x, w, b, gamma, beta):
    """x: (N, Cin, D, H, W)  w: (Cout, Cin, kD, kH, kW)  -> (N, Cout, D, H, W).

    Conv bias `b` is mathematically cancelled by the train-mode BatchNorm mean
    subtraction, so it is unused (kept for interface parity).
    """
    del b
    N, Cin, D, H, W = x.shape
    Cout, _, kD, kH, kW = w.shape
    pd, ph, pw = (kD - 1) // 2, (kH - 1) // 2, (kW - 1) // 2
    Dp, Hp, Wp = D + 2 * pd, H + 2 * ph, W + 2 * pw
    WpC = Wp * Cin                      # slab lane width / per-kh contraction
    # TODO(synk): when Cin is very small, Wp*Cin < 128 under-fills vregs; pad Cin
    # or fold part of H into the lane dim for production channel counts.

    # pad Cout so the lane dimension W*Coutp is a multiple of 128 (unmasked stores)
    q = 128 // math.gcd(W, 128)
    Coutp = ((Cout + q - 1) // q) * q
    WCp = W * Coutp

    vmem_limit = _vmem_limit_bytes()
    slab_bytes = Dp * Hp * WpC * 2
    w_bytes = kD * kH * WpC * WCp * 2
    budget = max(vmem_limit // 2 - 2 * slab_bytes - 2 * w_bytes, 1 << 20)
    TD = _pick_td(D, H, WpC, WCp, kH, budget)
    nchunks = D // TD
    TDH = TD * H
    R = N * D * H                       # rows of the 2-D intermediate

    # ---- glue: channels-last padded bf16 slab, stored once (no window copy) ----
    xcl = jnp.transpose(x, (0, 2, 3, 4, 1)).astype(jnp.bfloat16)    # (N,D,H,W,Cin)
    xp = jnp.pad(xcl, ((0, 0), (pd, pd), (ph, ph), (pw, pw), (0, 0)))
    xp = xp.reshape(N, Dp, Hp, WpC)

    # ---- glue: Toeplitz-along-W weight, kH folded into K: (kD, kH*WpC, WCp) bf16 ----
    wt = jnp.transpose(w, (2, 3, 4, 1, 0)).astype(jnp.float32)      # (kD,kH,kW,Cin,Cout)
    onehot = (jnp.arange(Wp)[None, :, None]
              == (jnp.arange(W)[None, None, :]
                  + jnp.arange(kW)[:, None, None])).astype(jnp.float32)
    t6 = jnp.einsum('ijlcq,lpw->ijpcwq', wt, onehot)                # (kD,kH,Wp,Cin,W,Cout)
    t6 = jnp.pad(t6, ((0, 0),) * 5 + ((0, Coutp - Cout),))
    wtoe = t6.reshape(kD, kH * WpC, WCp).astype(jnp.bfloat16)
    # TODO(synk): for large W*Cout this W-expanded weight should be tiled along W
    # (sub-Toeplitz per W-tile) and pinned single-buffered to fit v7x's 64 MiB VMEM.

    # ---- pass 1: conv + per-sample BN statistics ----
    kernel1 = _make_conv_stats_kernel(kD, kH, TD, H, WpC, WCp)
    y2d, stats = pl.pallas_call(
        kernel1,
        out_shape=(jax.ShapeDtypeStruct((R, WCp), jnp.bfloat16),
                   jax.ShapeDtypeStruct((N, 2, WCp), jnp.float32)),
        grid=(N, nchunks),
        in_specs=[pl.BlockSpec((None, Dp, Hp, WpC), lambda n, c: (n, 0, 0, 0)),
                  pl.BlockSpec((kD, kH * WpC, WCp), lambda n, c: (0, 0, 0))],
        out_specs=(pl.BlockSpec((TDH, WCp), lambda n, c: (n * nchunks + c, 0)),
                   pl.BlockSpec((None, 2, WCp), lambda n, c: (n, 0, 0))),
        compiler_params=pltpu.CompilerParams(
            dimension_semantics=("parallel", "arbitrary"),
            vmem_limit_bytes=vmem_limit),
    )(xp, wtoe)

    # ---- glue: finalize batch statistics -> folded scale / shift ----
    s = stats.sum(axis=0).reshape(2, W, Coutp).sum(axis=1)          # (2, Coutp)
    count = jnp.float32(N * D * H * W)
    mean = s[0] / count
    var = jnp.maximum(s[1] / count - mean * mean, 0.0)              # biased, single-pass
    gamma_p = jnp.pad(gamma.astype(jnp.float32), (0, Coutp - Cout))
    beta_p = jnp.pad(beta.astype(jnp.float32), (0, Coutp - Cout))
    scale = gamma_p * jax.lax.rsqrt(var + BN_EPS)
    shift = beta_p - mean * scale
    scale_w = jnp.tile(scale, W).reshape(1, WCp)
    shift_w = jnp.tile(shift, W).reshape(1, WCp)

    # ---- pass 2: normalize + LeakyReLU (parallel, big row tiles, in-place) ----
    TR = _pick_tr(R, WCp, vmem_limit)
    out2d = pl.pallas_call(
        _norm_act_kernel,
        out_shape=jax.ShapeDtypeStruct((R, WCp), jnp.bfloat16),
        grid=(R // TR,),
        in_specs=[pl.BlockSpec((TR, WCp), lambda r: (r, 0)),
                  pl.BlockSpec((1, WCp), lambda r: (0, 0)),
                  pl.BlockSpec((1, WCp), lambda r: (0, 0))],
        out_specs=pl.BlockSpec((TR, WCp), lambda r: (r, 0)),
        input_output_aliases={0: 0},
        compiler_params=pltpu.CompilerParams(
            dimension_semantics=("parallel",),
            vmem_limit_bytes=vmem_limit),
    )(y2d, scale_w, shift_w)

    # ---- glue: back to NCDHW (drop channel padding), f32 like the PyTorch module ----
    out = out2d.reshape(N, D, H, W, Coutp)[..., :Cout].astype(jnp.float32)
    return jnp.transpose(out, (0, 4, 1, 2, 3))


def reference_forward(x, w, b, gamma, beta):
    """Pure-JAX reference mirroring the PyTorch forward (train-mode BN, LeakyReLU)."""
    kD, kH, kW = w.shape[2:]
    pd, ph, pw = (kD - 1) // 2, (kH - 1) // 2, (kW - 1) // 2
    y = jax.lax.conv_general_dilated(
        x.astype(jnp.float32), w.astype(jnp.float32),
        window_strides=(1, 1, 1),
        padding=((pd, pd), (ph, ph), (pw, pw)),
        dimension_numbers=("NCDHW", "OIDHW", "NCDHW"))
    y = y + b.reshape(1, -1, 1, 1, 1)
    mean = y.mean(axis=(0, 2, 3, 4), keepdims=True)
    var = jnp.square(y - mean).mean(axis=(0, 2, 3, 4), keepdims=True)
    yh = (y - mean) / jnp.sqrt(var + BN_EPS)
    yh = yh * gamma.reshape(1, -1, 1, 1, 1) + beta.reshape(1, -1, 1, 1, 1)
    return jnp.where(yh >= 0, yh, LEAKY_SLOPE * yh)


if __name__ == "__main__":
    key = jax.random.PRNGKey(0)
    N, Cin, Cout = 2, 4, 8
    D, H, W = 8, 8, 8
    kD = kH = kW = 3

    k_x, k_w, k_b, k_g, k_be = jax.random.split(key, 5)
    x = jax.random.normal(k_x, (N, Cin, D, H, W), dtype=jnp.float32)
    conv_w = 0.1 * jax.random.normal(k_w, (Cout, Cin, kD, kH, kW), dtype=jnp.float32)
    conv_b = 0.05 * jax.random.normal(k_b, (Cout,), dtype=jnp.float32)
    bn_gamma = 1.0 + 0.1 * jax.random.normal(k_g, (Cout,), dtype=jnp.float32)
    bn_beta = 0.1 * jax.random.normal(k_be, (Cout,), dtype=jnp.float32)

    fwd = jax.jit(unit_conv_forward)
    out = fwd(x, conv_w, conv_b, bn_gamma, bn_beta)
    out = jax.block_until_ready(out)

    ref = reference_forward(x, conv_w, conv_b, bn_gamma, bn_beta)
    assert out.shape == (N, Cout, D, H, W)
    maxdiff = float(jnp.max(jnp.abs(out - ref)))
    # bf16 matmul operands + bf16 intermediate/output storage vs f32 reference
    assert maxdiff < 6e-2, f"mismatch vs reference: max abs diff = {maxdiff}"

    print("KERNEL_OK")
</pallas_src>

<mosaic_0001>
module attributes {stable_mosaic.version = 11 : i64} {
  func.func @kernel(%arg0: i32, %arg1: i32, %arg2: memref<1x10x10x40xbf16, #tpu.memory_space<vmem>>, %arg3: memref<3x120x128xbf16, #tpu.memory_space<vmem>>, %arg4: memref<64x128xbf16, #tpu.memory_space<vmem>>, %arg5: memref<1x2x128xf32, #tpu.memory_space<vmem>>) attributes {dimension_semantics = [#tpu.dimension_semantics<parallel>, #tpu.dimension_semantics<arbitrary>], iteration_bounds = array<i64: 2, 1>, scalar_prefetch = 0 : i64, scratch_operands = 0 : i64, tpu.core_type = #tpu.core_type<tc>, window_params = [{transform_indices = @transform_0, window_bounds = array<i64: 1, 10, 10, 40>}, {pipeline_mode = #tpu.pipeline_mode<synchronous>, transform_indices = @transform_1, window_bounds = array<i64: 3, 120, 128>}, {transform_indices = @transform_2, window_bounds = array<i64: 64, 128>}, {transform_indices = @transform_3, window_bounds = array<i64: 1, 2, 128>}]} {
    %c0_i32 = arith.constant 0 : i32
    %0 = arith.cmpi eq, %arg1, %c0_i32 : i32
    %1 = arith.extui %0 : i1 to i32
    %c0_i32_0 = arith.constant 0 : i32
    %2 = arith.cmpi ne, %1, %c0_i32_0 : i32
    scf.if %2 {
      %cst_30 = arith.constant 0.000000e+00 : f32
      %59 = vector.broadcast %cst_30 : f32 to vector<2x128xf32>
      %c0_31 = arith.constant 0 : index
      %c0_32 = arith.constant 0 : index
      %c0_33 = arith.constant 0 : index
      %60 = vector.load %arg5[%c0_31, %c0_32, %c0_33] : memref<1x2x128xf32, #tpu.memory_space<vmem>>, vector<1x2x128xf32>
      %61 = vector.shape_cast %60 : vector<1x2x128xf32> to vector<2x128xf32>
      %62 = vector.shape_cast %59 : vector<2x128xf32> to vector<1x2x128xf32>
      tpu.vector_store %arg5[%c0_31, %c0_32, %c0_33], %62 {strides = array<i32>} : memref<1x2x128xf32, #tpu.memory_space<vmem>>, vector<1x2x128xf32>,
    } else {
    }
    %c8_i32 = arith.constant 8 : i32
    %3 = arith.muli %arg1, %c8_i32 : i32
    %4 = tpu.assume_multiple %3, 8 : i32
    %cst = arith.constant 0.000000e+00 : f32
    %5 = vector.broadcast %cst : f32 to vector<64x128xf32>
    %c0_i32_1 = arith.constant 0 : i32
    %6 = arith.addi %4, %c0_i32_1 : i32
    %c0 = arith.constant 0 : index
    %7 = arith.index_cast %6 : i32 to index
    %c0_2 = arith.constant 0 : index
    %c0_3 = arith.constant 0 : index
    %8 = vector.load %arg2[%c0, %7, %c0_2, %c0_3] : memref<1x10x10x40xbf16, #tpu.memory_space<vmem>>, vector<1x8x10x40xbf16>
    %9 = vector.shape_cast %8 : vector<1x8x10x40xbf16> to vector<8x10x40xbf16>
    %10 = vector.extract_strided_slice %9 {offsets = [0, 0, 0], sizes = [8, 8, 40], strides = [1, 1, 1]} : vector<8x10x40xbf16> to vector<8x8x40xbf16>
    %11 = vector.extract_strided_slice %9 {offsets = [0, 1, 0], sizes = [8, 8, 40], strides = [1, 1, 1]} : vector<8x10x40xbf16> to vector<8x8x40xbf16>
    %12 = vector.extract_strided_slice %9 {offsets = [0, 2, 0], sizes = [8, 8, 40], strides = [1, 1, 1]} : vector<8x10x40xbf16> to vector<8x8x40xbf16>
    %13 = tpu.concatenate %10, %11, %12 in 2 : vector<8x8x40xbf16>, vector<8x8x40xbf16>, vector<8x8x40xbf16> -> vector<8x8x120xbf16>
    %14 = vector.shape_cast %13 : vector<8x8x120xbf16> to vector<64x120xbf16>
    %c0_4 = arith.constant 0 : index
    %c0_5 = arith.constant 0 : index
    %c0_6 = arith.constant 0 : index
    %15 = vector.load %arg3[%c0_4, %c0_5, %c0_6] : memref<3x120x128xbf16, #tpu.memory_space<vmem>>, vector<1x120x128xbf16>
    %16 = vector.shape_cast %15 : vector<1x120x128xbf16> to vector<120x128xbf16>
    %cst_7 = arith.constant dense<0.000000e+00> : vector<64x128xf32>
    %17 = tpu.matmul %14, %16, %cst_7 {dimension_numbers = #tpu.dot_dimension_numbers<[1], [0], [0], [1], [0, 0, 1, 1], [], []>} : vector<64x120xbf16>, vector<120x128xbf16>, vector<64x128xf32> -> vector<64x128xf32>
    %18 = arith.addf %5, %17 : vector<64x128xf32>
    %c1_i32 = arith.constant 1 : i32
    %19 = arith.addi %4, %c1_i32 : i32
    %c0_8 = arith.constant 0 : index
    %20 = arith.index_cast %19 : i32 to index
    %c0_9 = arith.constant 0 : index
    %c0_10 = arith.constant 0 : index
    %21 = vector.load %arg2[%c0_8, %20, %c0_9, %c0_10] : memref<1x10x10x40xbf16, #tpu.memory_space<vmem>>, vector<1x8x10x40xbf16>
    %22 = vector.shape_cast %21 : vector<1x8x10x40xbf16> to vector<8x10x40xbf16>
    %23 = vector.extract_strided_slice %22 {offsets = [0, 0, 0], sizes = [8, 8, 40], strides = [1, 1, 1]} : vector<8x10x40xbf16> to vector<8x8x40xbf16>
    %24 = vector.extract_strided_slice %22 {offsets = [0, 1, 0], sizes = [8, 8, 40], strides = [1, 1, 1]} : vector<8x10x40xbf16> to vector<8x8x40xbf16>
    %25 = vector.extract_strided_slice %22 {offsets = [0, 2, 0], sizes = [8, 8, 40], strides = [1, 1, 1]} : vector<8x10x40xbf16> to vector<8x8x40xbf16>
    %26 = tpu.concatenate %23, %24, %25 in 2 : vector<8x8x40xbf16>, vector<8x8x40xbf16>, vector<8x8x40xbf16> -> vector<8x8x120xbf16>
    %27 = vector.shape_cast %26 : vector<8x8x120xbf16> to vector<64x120xbf16>
    %c1 = arith.constant 1 : index
    %c0_11 = arith.constant 0 : index
    %c0_12 = arith.constant 0 : index
    %28 = vector.load %arg3[%c1, %c0_11, %c0_12] : memref<3x120x128xbf16, #tpu.memory_space<vmem>>, vector<1x120x128xbf16>
    %29 = vector.shape_cast %28 : vector<1x120x128xbf16> to vector<120x128xbf16>
    %cst_13 = arith.constant dense<0.000000e+00> : vector<64x128xf32>
    %30 = tpu.matmul %27, %29, %cst_13 {dimension_numbers = #tpu.dot_dimension_numbers<[1], [0], [0], [1], [0, 0, 1, 1], [], []>} : vector<64x120xbf16>, vector<120x128xbf16>, vector<64x128xf32> -> vector<64x128xf32>
    %31 = arith.addf %18, %30 : vector<64x128xf32>
    %c2_i32 = arith.constant 2 : i32
    %32 = arith.addi %4, %c2_i32 : i32
    %c0_14 = arith.constant 0 : index
    %33 = arith.index_cast %32 : i32 to index
    %c0_15 = arith.constant 0 : index
    %c0_16 = arith.constant 0 : index
    %34 = vector.load %arg2[%c0_14, %33, %c0_15, %c0_16] : memref<1x10x10x40xbf16, #tpu.memory_space<vmem>>, vector<1x8x10x40xbf16>
    %35 = vector.shape_cast %34 : vector<1x8x10x40xbf16> to vector<8x10x40xbf16>
    %36 = vector.extract_strided_slice %35 {offsets = [0, 0, 0], sizes = [8, 8, 40], strides = [1, 1, 1]} : vector<8x10x40xbf16> to vector<8x8x40xbf16>
    %37 = vector.extract_strided_slice %35 {offsets = [0, 1, 0], sizes = [8, 8, 40], strides = [1, 1, 1]} : vector<8x10x40xbf16> to vector<8x8x40xbf16>
    %38 = vector.extract_strided_slice %35 {offsets = [0, 2, 0], sizes = [8, 8, 40], strides = [1, 1, 1]} : vector<8x10x40xbf16> to vector<8x8x40xbf16>
    %39 = tpu.concatenate %36, %37, %38 in 2 : vector<8x8x40xbf16>, vector<8x8x40xbf16>, vector<8x8x40xbf16> -> vector<8x8x120xbf16>
    %40 = vector.shape_cast %39 : vector<8x8x120xbf16> to vector<64x120xbf16>
    %c2 = arith.constant 2 : index
    %c0_17 = arith.constant 0 : index
    %c0_18 = arith.constant 0 : index
    %41 = vector.load %arg3[%c2, %c0_17, %c0_18] : memref<3x120x128xbf16, #tpu.memory_space<vmem>>, vector<1x120x128xbf16>
    %42 = vector.shape_cast %41 : vector<1x120x128xbf16> to vector<120x128xbf16>
    %cst_19 = arith.constant dense<0.000000e+00> : vector<64x128xf32>
    %43 = tpu.matmul %40, %42, %cst_19 {dimension_numbers = #tpu.dot_dimension_numbers<[1], [0], [0], [1], [0, 0, 1, 1], [], []>} : vector<64x120xbf16>, vector<120x128xbf16>, vector<64x128xf32> -> vector<64x128xf32>
    %44 = arith.addf %31, %43 : vector<64x128xf32>
    %45 = arith.truncf %44 : vector<64x128xf32> to vector<64x128xbf16>
    %c0_20 = arith.constant 0 : index
    %c0_21 = arith.constant 0 : index
    %46 = vector.load %arg4[%c0_20, %c0_21] : memref<64x128xbf16, #tpu.memory_space<vmem>>, vector<64x128xbf16>
    tpu.vector_store %arg4[%c0_20, %c0_21], %45 {strides = array<i32>} : memref<64x128xbf16, #tpu.memory_space<vmem>>, vector<64x128xbf16>,
    %c0_22 = arith.constant 0 : index
    %c0_23 = arith.constant 0 : index
    %c0_24 = arith.constant 0 : index
    %47 = vector.load %arg5[%c0_22, %c0_23, %c0_24] : memref<1x2x128xf32, #tpu.memory_space<vmem>>, vector<1x2x128xf32>
    %48 = vector.shape_cast %47 : vector<1x2x128xf32> to vector<2x128xf32>
    %cst_25 = arith.constant dense<0.000000e+00> : vector<128xf32>
    %49 = vector.multi_reduction <add>, %44, %cst_25 [0] : vector<64x128xf32> to vector<128xf32>
    %50 = vector.shape_cast %49 : vector<128xf32> to vector<1x128xf32>
    %51 = arith.mulf %44, %44 : vector<64x128xf32>
    %cst_26 = arith.constant dense<0.000000e+00> : vector<128xf32>
    %52 = vector.multi_reduction <add>, %51, %cst_26 [0] : vector<64x128xf32> to vector<128xf32>
    %53 = vector.shape_cast %52 : vector<128xf32> to vector<1x128xf32>
    %54 = tpu.concatenate %50, %53 in 0 : vector<1x128xf32>, vector<1x128xf32> -> vector<2x128xf32>
    %55 = arith.addf %48, %54 : vector<2x128xf32>
    %c0_27 = arith.constant 0 : index
    %c0_28 = arith.constant 0 : index
    %c0_29 = arith.constant 0 : index
    %56 = vector.load %arg5[%c0_27, %c0_28, %c0_29] : memref<1x2x128xf32, #tpu.memory_space<vmem>>, vector<1x2x128xf32>
    %57 = vector.shape_cast %56 : vector<1x2x128xf32> to vector<2x128xf32>
    %58 = vector.shape_cast %55 : vector<2x128xf32> to vector<1x2x128xf32>
    tpu.vector_store %arg5[%c0_27, %c0_28, %c0_29], %58 {strides = array<i32>} : memref<1x2x128xf32, #tpu.memory_space<vmem>>, vector<1x2x128xf32>,
    return
  }
  func.func @transform_0(%arg0: i32, %arg1: i32) -> (i32, i32, i32, i32) {
    %c0_i32 = arith.constant 0 : i32
    %c0_i32_0 = arith.constant 0 : i32
    %c0_i32_1 = arith.constant 0 : i32
    %c0_i32_2 = arith.constant 0 : i32
    return %arg0, %c0_i32, %c0_i32_0, %c0_i32_1 : i32, i32, i32, i32
  }
  func.func @transform_1(%arg0: i32, %arg1: i32) -> (i32, i32, i32) {
    %c0_i32 = arith.constant 0 : i32
    %c0_i32_0 = arith.constant 0 : i32
    %c0_i32_1 = arith.constant 0 : i32
    %c0_i32_2 = arith.constant 0 : i32
    return %c0_i32, %c0_i32_0, %c0_i32_1 : i32, i32, i32
  }
  func.func @transform_2(%arg0: i32, %arg1: i32) -> (i32, i32) {
    %c1_i32 = arith.constant 1 : i32
    %0 = arith.muli %arg0, %c1_i32 : i32
    %1 = arith.addi %0, %arg1 : i32
    %c0_i32 = arith.constant 0 : i32
    %c0_i32_0 = arith.constant 0 : i32
    return %1, %c0_i32 : i32, i32
  }
  func.func @transform_3(%arg0: i32, %arg1: i32) -> (i32, i32, i32) {
    %c0_i32 = arith.constant 0 : i32
    %c0_i32_0 = arith.constant 0 : i32
    %c0_i32_1 = arith.constant 0 : i32
    return %arg0, %c0_i32, %c0_i32_0 : i32, i32, i32
  }
}

module attributes {stable_mosaic.version = 11 : i64} {
  func.func @_norm_act_kernel(%arg0: i32, %arg1: memref<128x128xbf16, #tpu.memory_space<vmem>>, %arg2: memref<1x128xf32, #tpu.memory_space<vmem>>, %arg3: memref<1x128xf32, #tpu.memory_space<vmem>>, %arg4: memref<128x128xbf16, #tpu.memory_space<vmem>>) attributes {dimension_semantics = [#tpu.dimension_semantics<parallel>], iteration_bounds = array<i64: 1>, scalar_prefetch = 0 : i64, scratch_operands = 0 : i64, tpu.core_type = #tpu.core_type<tc>, window_params = [{transform_indices = @transform_0, window_bounds = array<i64: 128, 128>}, {pipeline_mode = #tpu.pipeline_mode<synchronous>, transform_indices = @transform_1, window_bounds = array<i64: 1, 128>}, {pipeline_mode = #tpu.pipeline_mode<synchronous>, transform_indices = @transform_2, window_bounds = array<i64: 1, 128>}, {transform_indices = @transform_3, window_bounds = array<i64: 128, 128>}]} {
    %c0 = arith.constant 0 : index
    %c0_0 = arith.constant 0 : index
    %0 = vector.load %arg1[%c0, %c0_0] : memref<128x128xbf16, #tpu.memory_space<vmem>>, vector<128x128xbf16>
    %1 = arith.extf %0 : vector<128x128xbf16> to vector<128x128xf32>
    %c0_1 = arith.constant 0 : index
    %c0_2 = arith.constant 0 : index
    %2 = vector.load %arg2[%c0_1, %c0_2] : memref<1x128xf32, #tpu.memory_space<vmem>>, vector<1x128xf32>
    %3 = vector.broadcast %2 : vector<1x128xf32> to vector<128x128xf32>
    %4 = arith.mulf %1, %3 : vector<128x128xf32>
    %c0_3 = arith.constant 0 : index
    %c0_4 = arith.constant 0 : index
    %5 = vector.load %arg3[%c0_3, %c0_4] : memref<1x128xf32, #tpu.memory_space<vmem>>, vector<1x128xf32>
    %6 = vector.broadcast %5 : vector<1x128xf32> to vector<128x128xf32>
    %7 = arith.addf %4, %6 : vector<128x128xf32>
    %cst = arith.constant 0.000000e+00 : f32
    %8 = vector.broadcast %cst : f32 to vector<128x128xf32>
    %9 = arith.cmpf oge, %7, %8 : vector<128x128xf32>
    %cst_5 = arith.constant 0.00999999977 : f32
    %10 = vector.broadcast %cst_5 : f32 to vector<128x128xf32>
    %11 = arith.mulf %10, %7 : vector<128x128xf32>
    %12 = arith.select %9, %7, %11 : vector<128x128xi1>, vector<128x128xf32>
    %13 = arith.truncf %12 : vector<128x128xf32> to vector<128x128xbf16>
    %c0_6 = arith.constant 0 : index
    %c0_7 = arith.constant 0 : index
    %14 = vector.load %arg4[%c0_6, %c0_7] : memref<128x128xbf16, #tpu.memory_space<vmem>>, vector<128x128xbf16>
    tpu.vector_store %arg4[%c0_6, %c0_7], %13 {strides = array<i32>} : memref<128x128xbf16, #tpu.memory_space<vmem>>, vector<128x128xbf16>,
    return
  }
  func.func @transform_0(%arg0: i32) -> (i32, i32) {
    %c0_i32 = arith.constant 0 : i32
    %c0_i32_0 = arith.constant 0 : i32
    return %arg0, %c0_i32 : i32, i32
  }
  func.func @transform_1(%arg0: i32) -> (i32, i32) {
    %c0_i32 = arith.constant 0 : i32
    %c0_i32_0 = arith.constant 0 : i32
    %c0_i32_1 = arith.constant 0 : i32
    return %c0_i32, %c0_i32_0 : i32, i32
  }
  func.func @transform_2(%arg0: i32) -> (i32, i32) {
    %c0_i32 = arith.constant 0 : i32
    %c0_i32_0 = arith.constant 0 : i32
    %c0_i32_1 = arith.constant 0 : i32
    return %c0_i32, %c0_i32_0 : i32, i32
  }
  func.func @transform_3(%arg0: i32) -> (i32, i32) {
    %c0_i32 = arith.constant 0 : i32
    %c0_i32_0 = arith.constant 0 : i32
    return %arg0, %c0_i32 : i32, i32
  }
}

</mosaic_0001>

<bundles_post_ra>
// kernel: tile.13
= control target key start
LH: loop header
LB: loop body
LE: loop exit
PB: predicated region body
PF: predicated region fallthrough
CT: control target
= control target key end

     0   :  { %s22_s0 = inlined_call_operand.vmem [shape: f32[16], index: 0, kind: input, shape index: {}]   ;;  %s23_s1 = inlined_call_operand.vmem [shape: f32[8,16], index: 1, kind: output, shape index: {}]  }
   0x1   :  { %v4_v0 = vld [vmem:[%s22_s0] ss:$0 sm:$0xff] }
   0x2   :  { %5 = vst [vmem:[%s23_s1] sm:$0xff] %v4_v0 }

// kernel: tile.14
= control target key start
LH: loop header
LB: loop body
LE: loop exit
PB: predicated region body
PF: predicated region fallthrough
CT: control target
= control target key end

     0   :  { %s67_s10 = smov 112   ;;  %s68_s11 = smov 80   ;;  %vm3_vm0 = vcmask 130048   ;;  %vm9_vm1 = vcmask 1048448   ;;  %vm15_vm2 = vcmask 917248   ;;  %vm21_vm3 = vcmask 786048   ;;  %s111_s0 = inlined_call_operand.vmem [shape: f32[8,16], index: 0, kind: input, shape index: {}]   ;;  %s112_s1 = inlined_call_operand.vmem [shape: f32[1,128], index: 1, kind: output, shape index: {}]  }
   0x1   :  { %v53_v0 = vld [vmem:[%s111_s0 + $0x7] sm:$0x1]   ;;  %v55_v1 = vld [vmem:[%s111_s0 + $0x5] sm:$0x1]   ;;  %v54_v2 = vld [vmem:[%s111_s0 + $0x6] sm:$0x1]  }
   0x2   :  { %7 = vrot.lane.b32.xlu0 %v53_v0, %s67_s10  ;;  %19 = vrot.lane.b32.xlu1 %v55_v1, %s68_s11  ;;  %v56_v3 = vld [vmem:[%s111_s0 + $0x4] sm:$0x1]   ;;  %v2_v4 = vld [vmem:[%s111_s0] sm:$0x1]   ;;  %s69_s18 = smov 96   ;;  %s70_s19 = smov 64  }
   0x3   :  { %4 = vst.msk [vmem:[#allocation0] sm:$0x1] %vm3_vm0, %v2_v4   ;;  %v57_v5 = vld [vmem:[%s111_s0 + $0x3] sm:$0x1]   ;;  %v58_v6 = vld [vmem:[%s111_s0 + $0x2] sm:$0x1]  }
   0x4   :  { %s71_s24 = smov 48   ;;  %s72_s25 = smov 32   ;;  %v59_v7 = vld [vmem:[%s111_s0 + $0x1] sm:$0x1]   ;;  %vm27_vm4 = vcmask 654848   ;;  %vm33_vm5 = vcmask 523648  }
   0x5   :  { %s73_s0 = smov 16   ;;  %vm39_vm6 = vcmask 392448   ;;  %vm45_vm7 = vcmask 261248  }
   0x6   :  { %13 = vrot.lane.b32.xlu0 %v54_v2, %s69_s18  ;;  %25 = vrot.lane.b32.xlu1 %v56_v3, %s70_s19 }
   0xa   :  { %31 = vrot.lane.b32.xlu0 %v57_v5, %s71_s24  ;;  %37 = vrot.lane.b32.xlu1 %v58_v6, %s72_s25 }
   0xe   :  { %43 = vrot.lane.b32.xlu0 %v59_v7, %s73_s0 }
  0x74   :  { %v8_v8 = vpop.permute.xlu0 %7   ;;  %v20_v9 = vpop.permute.xlu1 %19  }
  0x75   :  { %10 = vst.msk [vmem:[#allocation0] sm:$0x1] %vm9_vm1, %v8_v8  }
  0x78   :  { %v14_v10 = vpop.permute.xlu0 %13   ;;  %v26_v11 = vpop.permute.xlu1 %25  }
  0x79   :  { %16 = vst.msk [vmem:[#allocation0] sm:$0x1] %vm15_vm2, %v14_v10  }
  0x7a   :  { %22 = vst.msk [vmem:[#allocation0] sm:$0x1] %vm21_vm3, %v20_v9  }
  0x7b   :  { %28 = vst.msk [vmem:[#allocation0] sm:$0x1] %vm27_vm4, %v26_v11  }
  0x7c   :  { %v32_v12 = vpop.permute.xlu0 %31   ;;  %v38_v13 = vpop.permute.xlu1 %37  }
  0x7d   :  { %34 = vst.msk [vmem:[#allocation0] sm:$0x1] %vm33_vm5, %v32_v12  }
  0x7e   :  { %40 = vst.msk [vmem:[#allocation0] sm:$0x1] %vm39_vm6, %v38_v13  }
  0x80   :  { %v44_v14 = vpop.permute.xlu0 %43  }
  0x81   :  { %46 = vst.msk [vmem:[#allocation0] sm:$0x1] %vm45_vm7, %v44_v14  }
  0x88   :  { %v50_v15 = vld [vmem:[#allocation0] sm:$0x1] }
  0x89   :  { %52 = vst [vmem:[%s112_s1] sm:$0x1] %v50_v15 }

// kernel: unit_conv_forward.2
= control target key start
LH: loop header
LB: loop body
LE: loop exit
PB: predicated region body
PF: predicated region fallthrough
CT: control target
= control target key end

     0   :  { %s1927_s12 = smov 0   ;;  %s1929_s13 = smov 0   ;;  %s2397_s0 = inlined_call_operand.vmem [shape: bf16[2,10,10,40], index: 0, kind: input, shape index: {}]   ;;  %s2398_s1 = inlined_call_operand.vmem [shape: bf16[3,120,128], index: 1, kind: input, shape index: {}]   ;;  %s2399_s2 = inlined_call_operand.vmem [shape: bf16[128,128], index: 2, kind: output, shape index: {0}]   ;;  %s2400_s3 = inlined_call_operand.vmem [shape: f32[2,2,128], index: 3, kind: output, shape index: {1}]  }
   0x1   :  { %s1931_s14 = smov 0  }
   0x2 LB: > { %s26_s15 = sadd.s32 1, %s1898_s13  ;;  %p1480_p0 = scmp.ge.s32.totalorder %s1902_s14, 1  ;;  %s1902_s14 = sphi %s1931_s14, %s14_s14   ;;  %s1898_s13 = sphi %s1929_s13, %s2402_s13   ;;  %s1894_s12 = sphi %s1927_s12, %s2401_s12  }
   0x3   : > { %p28_p1 = scmp.ge.s32.totalorder %s26_s15, 2  ;;  %p154_p2 = scmp.lt.s32.totalorder %s1902_s14, 3 }
   0x5   : > { %s2404_s15 = smov (%p28_p1, %s26_s15), 0  ;;  %p155_p3 = pnand %p1480_p0, %p154_p2 }
   0x6   : > { %p183_p4 = scmp.lt.s32.totalorder (!%p155_p3), %s1894_s12, 1  ;;  %v1856_v0 = vld [vmem:[%s2398_s1] sm:$0xff] (!%p155_p3)   ;;  %v1857_v1 = vld [vmem:[%s2398_s1 + $0x8] sm:$0xff] (!%p155_p3)   ;;  %v1858_v2 = vld [vmem:[%s2398_s1 + $0x10] sm:$0xff] (!%p155_p3)   ;;  %s1904_s6 = smov (!%p155_p3), 80   ;;  %vm709_vm0 = vcmask (!%p155_p3), 1043456  }
   0x7   : > { %158 = sbr.rel (%p155_p3) target bundleno = 476 (0x1dc), region = 28  ;;  %1720 = vmatprep.subr.bf16.mxu0 (!%p155_p3), %v1856_v0  ;;  %v1860_v3 = vld [vmem:[%s2398_s1 + $0x3c] sm:$0xff] (!%p155_p3)   ;;  %v1862_v20 = vld [vmem:[%s2398_s1 + $0x44] sm:$0xff] (!%p155_p3)   ;;  %v1864_v40 = vld [vmem:[%s2398_s1 + $0x4c] sm:$0xff] (!%p155_p3)   ;;  %s1905_s20 = smov (!%p155_p3), 40   ;;  %vm362_vm1 = vcmask (!%p155_p3), 326656  }
   0x8   : > { %1721 = vmatpush3.bf16.msra.mxu0 (!%p155_p3), %v1856_v0  ;;  %1696 = vmatprep.subr.bf16.mxu1 (!%p155_p3), %v1860_v3  ;;  %v1859_v15 = vld [vmem:[%s2398_s1 + $0x18] sm:$0xff] (!%p155_p3)   ;;  %v1861_v35 = vld [vmem:[%s2398_s1 + $0x20] sm:$0xff] (!%p155_p3)   ;;  %v1863_v52 = vld [vmem:[%s2398_s1 + $0x28] sm:$0xff] (!%p155_p3)   ;;  %vm387_vm2 = vcmask (!%p155_p3), 654336   ;;  %vm696_vm3 = vcmask (!%p155_p3), 982016   ;;  %s1482_s5 = sshll.u32 (!%p155_p3), %s1894_s12, 3 }
   0x9   : > { %1722 = vmatprep.subr.bf16.mxu0 (!%p155_p3), %v1857_v1  ;;  %1697 = vmatpush3.bf16.msra.mxu1 (!%p155_p3), %v1860_v3  ;;  %v1866_v53 = vld [vmem:[%s2398_s1 + $0x54] sm:$0xff] (!%p155_p3)   ;;  %v1868_v63 = vld [vmem:[%s2398_s1 + $0x5c] sm:$0xff] (!%p155_p3)   ;;  %p190_p5 = scmp.lt.s32.totalorder (!%p155_p3), %s1482_s5, 15  ;;  %vm1363_vm4 = vcmask (!%p155_p3), 1040384  }
   0xa   : > { %1698 = vmatprep.subr.bf16.mxu1 (!%p155_p3), %v1862_v20  ;;  %v1865_v62 = vld [vmem:[%s2398_s1 + $0x30] sm:$0xff] (!%p155_p3)  }
   0xc   : > { %1723 = vmatpush3.bf16.msra.mxu0 (!%p155_p3), %v1857_v1 }
   0xd   : > { %1724 = vmatprep.subr.bf16.mxu0 (!%p155_p3), %v1858_v2  ;;  %1699 = vmatpush3.bf16.msra.mxu1 (!%p155_p3), %v1862_v20  ;;  %v1870_v20 = vld [vmem:[%s2398_s1 + $0x6c] sm:$0xff] (!%p155_p3)  }
   0xe   : > { %s1952_s18 = scalar_select %p183_p4, %s1894_s12, 1  ;;  %1700 = vmatprep.subr.bf16.mxu1 %v1864_v40 }
   0xf   : > { %s2406_s5 = smov (!%p190_p5, %s1482_s5), 15 }
  0x10   : > { %s1804_s21 = smul.u32 80, %s1952_s18  ;;  %1725 = vmatpush3.bf16.msra.mxu0 %v1858_v2  ;;  %s1484_s27 = sshll.u32 %s1952_s18, 1 }
  0x11   : > { %1726 = vmatprep.subr.bf16.mxu0 %v1859_v15  ;;  %1701 = vmatpush3.bf16.msra.mxu1 %v1864_v40  ;;  %s2373_s4 = scalar_lea.vmem %s2400_s3, %s1484_s27  ;;  %s1483_s18 = sshll.u32 %s2406_s5, 2 }
  0x12   : > { %s1967_s28 = scalar_lea.vmem %s2397_s0, %s1804_s21  ;;  %1702 = vmatprep.subr.bf16.mxu1 %v1866_v53  ;;  %s2380_s8 = scalar_lea.vmem %s2399_s2, %s1483_s18 }
  0x13   : > { %v1970_v4 = vld [vmem:[%s1967_s28 + $0x8] sm:$0xf]  ;;  %v213_v5 = vld [vmem:[%s1967_s28 + $0xc] sm:$0x1]  ;;  %v1974_v6 = vld [vmem:[%s1967_s28] sm:$0xf] }
  0x14   : > { %v1977_v7 = vcombine.low %v1970_v4, %v213_v5  ;;  %v211_v8 = vld [vmem:[%s1967_s28 + $0x4] sm:$0x1]  ;;  %v1981_v9 = vld [vmem:[%s1967_s28 + $0x18] sm:$0xf]  ;;  %v217_v10 = vld [vmem:[%s1967_s28 + $0x1c] sm:$0x1]  ;;  %1727 = vmatpush3.bf16.msra.mxu0 %v1859_v15 }
  0x15   : > { %v1485_v11 = vcombine.low %v1974_v6, %v211_v8  ;;  %v1488_v12 = vcombine.low %v1981_v9, %v217_v10  ;;  %v1987_v13 = vld [vmem:[%s1967_s28 + $0x10] sm:$0xf]  ;;  %v215_v14 = vld [vmem:[%s1967_s28 + $0x14] sm:$0x1]  ;;  %v2004_v24 = vld [vmem:[%s1967_s28 + $0x8] sm:$0xf]  ;;  %1728 = vmatprep.subr.bf16.mxu0 %v1861_v35  ;;  %1703 = vmatpush3.bf16.msra.mxu1 %v1866_v53 }
  0x16   : > { %v339_v16 = vrot.slane %v1977_v7, 1  ;;  %v1487_v17 = vcombine.low %v1987_v13, %v215_v14  ;;  %v1996_v18 = vld [vmem:[%s1967_s28 + $0x10] sm:$0xf]  ;;  %v1496_v19 = vld [vmem:[%s1967_s28 + $0x14] sm:$0x1]  ;;  %v276_v23 = vshll.u32 %v1977_v7, 16  ;;  %1704 = vmatprep.subr.bf16.mxu1 %v1868_v63 }
  0x17   : > { %v338_v21 = vrot.slane %v1485_v11, 1  ;;  %v269_v22 = vshll.u32 %v1485_v11, 16  ;;  %v341_v25 = vrot.slane %v1488_v12, 1  ;;  %v267_v28 = vshrl.u32 %v1485_v11, 16  ;;  %v1494_v29 = vld [vmem:[%s1967_s28 + $0xc] sm:$0x1] }
  0x18   : > { %348 = vrot.lane.b32.xlu1 %v339_v16, %s1904_s6  ;;  %v281_v26 = vshrl.u32 %v1487_v17, 16  ;;  %v283_v27 = vshll.u32 %v1487_v17, 16  ;;  %v340_v30 = vrot.slane %v1487_v17, 1  ;;  %v290_v32 = vshll.u32 %v1488_v12, 16  ;;  %v2013_v34 = vld [vmem:[%s1967_s28 + $0x20] sm:$0xf]  ;;  %1729 = vmatpush3.bf16.msra.mxu0 %v1861_v35 }
  0x19   : > { %346 = vrot.lane.b32.xlu0 %v338_v21, %s1904_s6  ;;  %v271_v31 = vrot.slane %v269_v22, 1  ;;  %v2010_v33 = vcombine.low %v1996_v18, %v1496_v19  ;;  %v2019_v37 = vcombine.low %v2004_v24, %v1494_v29  ;;  %v1500_v38 = vld [vmem:[%s1967_s28 + $0x24] sm:$0x1]  ;;  %v2023_v39 = vld [vmem:[%s1967_s28 + $0x18] sm:$0xf]  ;;  %v288_v41 = vshrl.u32 %v1488_v12, 16  ;;  %1730 = vmatprep.subr.bf16.mxu0 %v1863_v52 }
  0x1a   : > { %v285_v36 = vrot.slane %v283_v27, 1  ;;  %v274_v42 = vshrl.u32 %v1977_v7, 16  ;;  %v1498_v43 = vld [vmem:[%s1967_s28 + $0x1c] sm:$0x1]  ;;  %v292_v45 = vrot.slane %v290_v32, 1  ;;  %v278_v46 = vrot.slane %v276_v23, 1  ;;  %1705 = vmatpush3.bf16.msra.mxu1 %v1868_v63 }
  0x1b   : > { %v489_v47 = vshll.u32 %v2010_v33, 16  ;;  %v272_v48 = vor.u32 %v271_v31, %v267_v28  ;;  %v482_v49 = vshll.u32 %v2019_v37, 16  ;;  %v2035_v50 = vcombine.low %v2013_v34, %v1500_v38  ;;  %v2063_v8 = vld [vmem:[%s1967_s28 + $0x28] sm:$0xf]  ;;  %v221_v10 = vld [vmem:[%s1967_s28 + $0x2c] sm:$0x1] }
  0x1c   : > { %352 = vrot.lane.b32.xlu1 %v341_v25, %s1904_s6  ;;  %v286_v44 = vor.u32 %v285_v36, %v281_v26  ;;  %v2038_v51 = vcombine.low %v2023_v39, %v1498_v43  ;;  %v293_v54 = vor.u32 %v292_v45, %v288_v41  ;;  %v487_v55 = vshrl.u32 %v2010_v33, 16  ;;  %1731 = vmatpush3.bf16.msra.mxu0 %v1863_v52  ;;  %v2067_v11 = vld [vmem:[%s1967_s28 + $0x20] sm:$0xf]  ;;  %v219_v12 = vld [vmem:[%s1967_s28 + $0x24] sm:$0x1] }
  0x1d   : > { %350 = vrot.lane.b32.xlu0 %v340_v30, %s1904_s6  ;;  %v491_v56 = vrot.slane %v489_v47, 1  ;;  %v503_v57 = vshll.u32 %v2035_v50, 16  ;;  %v279_v58 = vor.u32 %v278_v46, %v274_v42  ;;  %v480_v59 = vshrl.u32 %v2019_v37, 16  ;;  %1732 = vmatprep.subr.bf16.mxu0 %v1865_v62  ;;  %v1869_v14 = vld [vmem:[%s2398_s1 + $0x64] sm:$0xff]   ;;  %v2078_v17 = vld [vmem:[%s1967_s28 + $0x38] sm:$0xf] }
  0x1e   : > { %v484_v60 = vrot.slane %v482_v49, 1  ;;  %v496_v61 = vshll.u32 %v2038_v51, 16  ;;  %v501_v1 = vshrl.u32 %v2035_v50, 16  ;;  %v494_v5 = vshrl.u32 %v2038_v51, 16  ;;  %v225_v19 = vld [vmem:[%s1967_s28 + $0x3c] sm:$0x1]  ;;  %1706 = vmatprep.subr.bf16.mxu1 %v1869_v14 }
  0x1f   : > { %v492_v0 = vor.u32 %v491_v56, %v487_v55  ;;  %v505_v2 = vrot.slane %v503_v57, 1  ;;  %v2075_v16 = vcombine.low %v2063_v8, %v221_v10  ;;  %v2086_v22 = vcombine.low %v2067_v11, %v219_v12  ;;  %v2089_v23 = vld [vmem:[%s1967_s28 + $0x30] sm:$0xf]  ;;  %v223_v25 = vld [vmem:[%s1967_s28 + $0x34] sm:$0x1]  ;;  %1707 = vmatpush3.bf16.msra.mxu1 %v1869_v14  ;;  %v2156_v10 = vld [vmem:[%s2398_s1 + $0x78] sm:$0xff]  }
  0x20   : > { %326 = vrot.lane.b32.xlu1 %v286_v44, %s1905_s20  ;;  %v485_v3 = vor.u32 %v484_v60, %v480_v59  ;;  %v498_v7 = vrot.slane %v496_v61, 1  ;;  %1733 = vmatpush3.bf16.msra.mxu0 %v1865_v62  ;;  %v2093_v26 = vcombine.low %v2078_v17, %v225_v19  ;;  %v552_v27 = vrot.slane %v2010_v33, 1  ;;  %v2105_v32 = vld [vmem:[%s1967_s28 + $0x30] sm:$0xf]  ;;  %v1504_v35 = vld [vmem:[%s1967_s28 + $0x34] sm:$0x1] }
  0x21   : > { %322 = vrot.lane.b32.xlu0 %v272_v48, %s1905_s20  ;;  %v506_v15 = vor.u32 %v505_v2, %v501_v1  ;;  %v304_v28 = vshll.u32 %v2075_v16, 16  ;;  %1708 = vmatprep.subr.bf16.mxu1 %v1870_v20  ;;  %v551_v29 = vrot.slane %v2019_v37, 1  ;;  %v297_v30 = vshll.u32 %v2086_v22, 16  ;;  %v2120_v45 = vld [vmem:[%s1967_s28 + $0x28] sm:$0xf] }
  0x22   : > { %v499_v21 = vor.u32 %v498_v7, %v494_v5  ;;  %v2102_v31 = vcombine.low %v2089_v23, %v223_v25  ;;  %v318_v36 = vshll.u32 %v2093_v26, 16  ;;  %v554_v33 = vrot.slane %v2035_v50, 1  ;;  %v1502_v46 = vld [vmem:[%s1967_s28 + $0x2c] sm:$0x1]  ;;  %v2130_v55 = vld [vmem:[%s1967_s28 + $0x18] sm:$0xf] }
  0x23   : > { %1709 = vmatpush3.bf16.msra.mxu1 %v1870_v20  ;;  %v553_v38 = vrot.slane %v2038_v51, 1  ;;  %v302_v37 = vshrl.u32 %v2075_v16, 16  ;;  %v306_v40 = vrot.slane %v304_v28, 1  ;;  %v295_v41 = vshrl.u32 %v2086_v22, 16  ;;  %v1567_v59 = vld [vmem:[%s1967_s28 + $0x1c] sm:$0x1] }
  0x24   : > { %328 = vrot.lane.b32.xlu1 %v293_v54, %s1905_s20  ;;  %v299_v42 = vrot.slane %v297_v30, 1  ;;  %v311_v43 = vshll.u32 %v2102_v31, 16  ;;  %v2117_v44 = vcombine.low %v2105_v32, %v1504_v35  ;;  %v316_v47 = vshrl.u32 %v2093_v26, 16  ;;  %v2142_v63 = vld [vmem:[%s1967_s28 + $0x10] sm:$0xf] }
  0x25   : > { %324 = vrot.lane.b32.xlu0 %v279_v58, %s1905_s20  ;;  %v320_v48 = vrot.slane %v318_v36, 1  ;;  %v307_v49 = vor.u32 %v306_v40, %v302_v37  ;;  %v309_v51 = vshrl.u32 %v2102_v31, 16  ;;  %v343_v54 = vrot.slane %v2075_v16, 1  ;;  %v2160_v14 = vld [vmem:[%s1967_s28 + $0x40] sm:$0xf] }
  0x26   : > { %v300_v50 = vor.u32 %v299_v42, %v295_v41  ;;  %v313_v52 = vrot.slane %v311_v43, 1  ;;  %v517_v53 = vshll.u32 %v2117_v44, 16  ;;  %v342_v56 = vrot.slane %v2086_v22, 1  ;;  %v2167_v19 = vld [vmem:[%s1967_s28 + $0x38] sm:$0xf] }
  0x27   : > { %v345_v57 = vrot.slane %v2093_v26, 1  ;;  %v2135_v58 = vcombine.low %v2120_v45, %v1502_v46  ;;  %v321_v60 = vor.u32 %v320_v48, %v316_v47  ;;  %v344_v61 = vrot.slane %v2102_v31, 1  ;;  %v1506_v20 = vld [vmem:[%s1967_s28 + $0x3c] sm:$0x1]  ;;  %v1571_v43 = vld [vmem:[%s1967_s28 + $0x2c] sm:$0x1] }
  0x28   : > { %537 = vrot.lane.b32.xlu1 %v492_v0, %s1905_s20  ;;  %v515_v62 = vshrl.u32 %v2117_v44, 16  ;;  %v1565_v0 = vld [vmem:[%s1967_s28 + $0x14] sm:$0x1]  ;;  %v314_v1 = vor.u32 %v313_v52, %v309_v51  ;;  %v519_v2 = vrot.slane %v517_v53, 1  ;;  %v2151_v7 = vcombine.low %v2130_v55, %v1567_v59  ;;  %v2202_v46 = vld [vmem:[%s1967_s28 + $0x20] sm:$0xf] }
  0x29   : > { %535 = vrot.lane.b32.xlu0 %v485_v3, %s1905_s20  ;;  %v1867_v3 = vld [vmem:[%s2398_s1 + $0x38] ss:$0 sps:$4 sm:$0xff]   ;;  %v508_v5 = vshrl.u32 %v2135_v58, 16  ;;  %v510_v12 = vshll.u32 %v2135_v58, 16  ;;  %v2175_v22 = vcombine.low %v2142_v63, %v1565_v0  ;;  %v2189_v30 = vcombine.low %v2167_v19, %v1506_v20  ;;  %v1569_v47 = vld [vmem:[%s1967_s28 + $0x24] sm:$0x1] }
  0x2a   : > { %1801 = vmatprep.subr.msk.bf16.mxu0 %vm709_vm0, %v1867_v3  ;;  %v856_v16 = vsel %vm709_vm0, %v1867_v3, 0  ;;  %v993_v25 = vshll.u32 %v2151_v7, 16  ;;  %v520_v31 = vor.u32 %v519_v2, %v515_v62  ;;  %v991_v35 = vshrl.u32 %v2151_v7, 16  ;;  %v2224_v20 = vld [vmem:[%s1967_s28 + $0x30] sm:$0xf] }
  0x2b   : > { %1735 = vmatpush3.bf16.msra.mxu0 %v856_v16  ;;  %v512_v28 = vrot.slane %v510_v12, 1  ;;  %v984_v40 = vshrl.u32 %v2175_v22, 16  ;;  %v524_v42 = vshll.u32 %v2189_v30, 16  ;;  %v522_v53 = vshrl.u32 %v2189_v30, 16  ;;  %v2220_v16 = vld [vmem:[%s1967_s28 + $0x38] sm:$0xf] }
  0x2c   : > { %541 = vrot.lane.b32.xlu1 %v506_v15, %s1905_s20  ;;  %v1508_v15 = vld [vmem:[%s1967_s28 + $0x44] sm:$0x1]  ;;  %1744 = vmatprep.subr.bf16.mxu0 %v2156_v10  ;;  %v995_v36 = vrot.slane %v993_v25, 1  ;;  %v556_v62 = vrot.slane %v2117_v44, 1  ;;  %v555_v2 = vrot.slane %v2135_v58, 1  ;;  %v1056_v58 = vrot.slane %v2151_v7, 1 }
  0x2d   : > { %539 = vrot.lane.b32.xlu0 %v499_v21, %s1905_s20  ;;  %v1871_v21 = vld [vmem:[%s2398_s1 + $0x74] ss:$0 sps:$4 sm:$0xff]   ;;  %v513_v37 = vor.u32 %v512_v28, %v508_v5  ;;  %v1575_v44 = vld [vmem:[%s1967_s28 + $0x3c] sm:$0x1] }
  0x2e   : > { %1800 = vmatprep.subr.msk.bf16.mxu1 %vm709_vm0, %v1871_v21  ;;  %v711_v26 = vsel %vm709_vm0, %v1871_v21, 0  ;;  %v996_v48 = vor.u32 %v995_v36, %v991_v35  ;;  %v1573_v21 = vld [vmem:[%s1967_s28 + $0x34] sm:$0x1]  ;;  %v1585_v25 = vcombine.low %v2220_v16, %v1575_v44  ;;  %v2238_v35 = vld [vmem:[%s1967_s28 + $0x40] sm:$0xf] }
  0x2f   : > { %1711 = vmatpush3.bf16.msra.mxu1 %v711_v26  ;;  %v1055_v26 = vrot.slane %v2175_v22, 1  ;;  %v1584_v28 = vcombine.low %v2224_v20, %v1573_v21  ;;  %v1577_v36 = vld [vmem:[%s1967_s28 + $0x44] sm:$0x1] }
  0x30   : > { %561 = vrot.lane.b32.xlu1 %v552_v27, %s1904_s6  ;;  %v2183_v27 = vcombine.low %v2160_v14, %v1508_v15  ;;  %1768 = vmatprep.subr.bf16.mxu1 %v2156_v10 }
  0x31   : > { %559 = vrot.lane.b32.xlu0 %v551_v29, %s1904_s6  ;;  %v986_v29 = vshll.u32 %v2175_v22, 16  ;;  %v1014_v22 = vshll.u32 %v1584_v28, 16 }
  0x33   : > { %v988_v41 = vrot.slane %v986_v29, 1  ;;  %v2234_v29 = vld [vmem:[%s1967_s28 + $0x48] sm:$0xf] }
  0x34   : > { %565 = vrot.lane.b32.xlu1 %v554_v33, %s1904_s6  ;;  %v531_v33 = vshll.u32 %v2183_v27, 16 }
  0x35   : > { %563 = vrot.lane.b32.xlu0 %v553_v38, %s1904_s6  ;;  %v2195_v38 = vld [vmem:[%s1967_s28 + $0x28] sm:$0xf]  ;;  %v989_v52 = vor.u32 %v988_v41, %v984_v40  ;;  %v557_v40 = vrot.slane %v2189_v30, 1  ;;  %v1586_v41 = vcombine.low %v2238_v35, %v1577_v36 }
  0x36   : > { %v1583_v51 = vcombine.low %v2195_v38, %v1571_v43  ;;  %v1019_v43 = vshrl.u32 %v1585_v25, 16 }
  0x38   : > { %332 = vrot.lane.b32.xlu1 %v307_v49, %s1905_s20  ;;  %v529_v49 = vshrl.u32 %v2183_v27, 16  ;;  %v1007_v59 = vshll.u32 %v1583_v51, 16  ;;  %v1005_v0 = vshrl.u32 %v1583_v51, 16 }
  0x39   : > { %330 = vrot.lane.b32.xlu0 %v300_v50, %s1905_s20  ;;  %v533_v50 = vrot.slane %v531_v33, 1  ;;  %v558_v33 = vrot.slane %v2183_v27, 1  ;;  %v1012_v27 = vshrl.u32 %v1584_v28, 16 }
  0x3c   : > { %336 = vrot.lane.b32.xlu1 %v321_v60, %s1905_s20 }
  0x3d   : > { %334 = vrot.lane.b32.xlu0 %v314_v1, %s1905_s20  ;;  %v1009_v1 = vrot.slane %v1007_v59, 1  ;;  %v1026_v59 = vshrl.u32 %v1586_v41, 16 }
  0x3f   : > { %v1010_v12 = vor.u32 %v1009_v1, %v1005_v0  ;;  %v1061_v1 = vrot.slane %v1586_v41, 1 }
  0x40   : > { %356 = vrot.lane.b32.xlu1 %v343_v54, %s1904_s6  ;;  %v526_v54 = vrot.slane %v524_v42, 1  ;;  %v1058_v42 = vrot.slane %v1583_v51, 1 }
  0x41   : > { %354 = vrot.lane.b32.xlu0 %v342_v56, %s1904_s6  ;;  %v1582_v56 = vcombine.low %v2202_v46, %v1569_v47 }
  0x42   : > { %v527_v60 = vor.u32 %v526_v54, %v522_v53 }
  0x43   : > { %v998_v3 = vshrl.u32 %v1582_v56, 16 }
  0x44   : > { %360 = vrot.lane.b32.xlu1 %v345_v57, %s1904_s6  ;;  %v534_v57 = vor.u32 %v533_v50, %v529_v49  ;;  %v1057_v49 = vrot.slane %v1582_v56, 1  ;;  %v1016_v50 = vrot.slane %v1014_v22, 1 }
  0x45   : > { %358 = vrot.lane.b32.xlu0 %v344_v61, %s1904_s6  ;;  %v1000_v61 = vshll.u32 %v1582_v56, 16  ;;  %v1060_v56 = vrot.slane %v1585_v25, 1 }
  0x47   : > { %v1002_v5 = vrot.slane %v1000_v61, 1 }
  0x48   : > { %545 = vrot.lane.b32.xlu1 %v520_v31, %s1905_s20  ;;  %v1579_v31 = vld [vmem:[%s1967_s28 + $0x4c] sm:$0x1] }
  0x49   : > { %543 = vrot.lane.b32.xlu0 %v513_v37, %s1905_s20  ;;  %v1003_v15 = vor.u32 %v1002_v5, %v998_v3  ;;  %v1021_v37 = vshll.u32 %v1585_v25, 16  ;;  %v1587_v7 = vcombine.low %v2234_v29, %v1579_v31 }
  0x4b   : > { %v1023_v47 = vrot.slane %v1021_v37, 1  ;;  %v1033_v54 = vshrl.u32 %v1587_v7, 16  ;;  %v1062_v0 = vrot.slane %v1587_v7, 1 }
  0x4c   : > { %1041 = vrot.lane.b32.xlu1 %v996_v48, %s1905_s20  ;;  %v1035_v48 = vshll.u32 %v1587_v7, 16 }
  0x4d   : > { %1039 = vrot.lane.b32.xlu0 %v989_v52, %s1905_s20  ;;  %v1028_v52 = vshll.u32 %v1586_v41, 16  ;;  %v1024_v53 = vor.u32 %v1023_v47, %v1019_v43 }
  0x4e   : > { %v1037_v30 = vrot.slane %v1035_v48, 1 }
  0x50   : > { %549 = vrot.lane.b32.xlu1 %v534_v57, %s1905_s20  ;;  %v1017_v57 = vor.u32 %v1016_v50, %v1012_v27  ;;  %v1038_v51 = vor.u32 %v1037_v30, %v1033_v54  ;;  %v1875_v50 = vld [vmem:[%s2398_s1 + $0x90] sm:$0xff]  }
  0x51   : > { %547 = vrot.lane.b32.xlu0 %v527_v60, %s1905_s20  ;;  %v1030_v60 = vrot.slane %v1028_v52, 1 }
  0x53   : > { %v1031_v61 = vor.u32 %v1030_v60, %v1026_v59  ;;  %v1876_v59 = vld [vmem:[%s2398_s1 + $0x98] sm:$0xff]  }
  0x54   : > { %569 = vrot.lane.b32.xlu1 %v556_v62, %s1904_s6  ;;  %v1059_v62 = vrot.slane %v1584_v28, 1 }
  0x55   : > { %567 = vrot.lane.b32.xlu0 %v555_v2, %s1904_s6 }
  0x58   : > { %1045 = vrot.lane.b32.xlu1 %v1010_v12, %s1905_s20 }
  0x59   : > { %1043 = vrot.lane.b32.xlu0 %v1003_v15, %s1905_s20 }
  0x5c   : > { %1065 = vrot.lane.b32.xlu1 %v1056_v58, %s1904_s6 }
  0x5d   : > { %1063 = vrot.lane.b32.xlu0 %v1055_v26, %s1904_s6 }
  0x60   : > { %573 = vrot.lane.b32.xlu1 %v558_v33, %s1904_s6 }
  0x61   : > { %571 = vrot.lane.b32.xlu0 %v557_v40, %s1904_s6 }
  0x64   : > { %1069 = vrot.lane.b32.xlu1 %v1058_v42, %s1904_s6  ;;  %v1874_v42 = vld [vmem:[%s2398_s1 + $0x88] sm:$0xff]  }
  0x65   : > { %1067 = vrot.lane.b32.xlu0 %v1057_v49, %s1904_s6 }
  0x68   : > { %1049 = vrot.lane.b32.xlu1 %v1024_v53, %s1905_s20 }
  0x69   : > { %1047 = vrot.lane.b32.xlu0 %v1017_v57, %s1905_s20 }
  0x6c   : > { %1053 = vrot.lane.b32.xlu1 %v1038_v51, %s1905_s20 }
  0x6d   : > { %1051 = vrot.lane.b32.xlu0 %v1031_v61, %s1905_s20 }
  0x70   : > { %1073 = vrot.lane.b32.xlu1 %v1060_v56, %s1904_s6 }
  0x71   : > { %1071 = vrot.lane.b32.xlu0 %v1059_v62, %s1904_s6 }
  0x74   : > { %1077 = vrot.lane.b32.xlu1 %v1062_v0, %s1904_s6  ;;  %v1878_v0 = vld [vmem:[%s2398_s1 + $0xa8] sm:$0xff]  }
  0x75   : > { %1075 = vrot.lane.b32.xlu0 %v1061_v1, %s1904_s6 }
  0x8a   : > { %v349_v2 = vpop.permute.xlu1 %348 }
  0x8b   : > { %v347_v3 = vpop.permute.xlu0 %346 }
  0x8e   : > { %v353_v5 = vpop.permute.xlu1 %352 }
  0x8f   : > { %v351_v12 = vpop.permute.xlu0 %350 }
  0x92   : > { %v327_v15 = vpop.permute.xlu1 %326 }
  0x93   : > { %v323_v44 = vpop.permute.xlu0 %322  ;;  %v371_v21 = vsel %vm362_vm1, %v1987_v13, %v327_v15 }
  0x94   : > { %v365_v58 = vsel %vm362_vm1, %v1974_v6, %v323_v44  ;;  %v393_v31 = vsel %vm387_vm2, %v371_v21, %v351_v12  ;;  %v1879_v12 = vld [vmem:[%s2398_s1 + $0xb0] ss:$0 sps:$4 sm:$0xff]  }
  0x95   : > { %v389_v7 = vsel %vm387_vm2, %v365_v58, %v347_v3 }
  0x96   : > { %v329_v25 = vpop.permute.xlu1 %328 }
  0x97   : > { %v374_v26 = vsel %vm362_vm1, %v1981_v9, %v329_v25  ;;  %v325_v28 = vpop.permute.xlu0 %324  ;;  %v1873_v9 = vld [vmem:[%s2398_s1 + $0x80] sm:$0xff]  }
  0x98   : > { %v395_v36 = vsel %vm387_vm2, %v374_v26, %v353_v5  ;;  %v368_v33 = vsel %vm362_vm1, %v1970_v4, %v325_v28  ;;  %v1213_v26 = vsel %vm709_vm0, %v1879_v12, 0 }
  0x99   : > { %v1549_v37 = vcombine.low %v393_v31, %v395_v36  ;;  %v391_v13 = vsel %vm387_vm2, %v368_v33, %v349_v2 }
  0x9a   : > { %v538_v40 = vpop.permute.xlu1 %537  ;;  %v1548_v6 = vcombine.low %v389_v7, %v391_v13 }
  0x9b   : > { %v536_v22 = vpop.permute.xlu0 %535  ;;  %v580_v43 = vsel %vm362_vm1, %v1996_v18, %v538_v40 }
  0x9c   : > { %1736 = vmatprep.mubr.msk.bf16.mxu0 %vm696_vm3, %v1548_v6  ;;  %v577_v48 = vsel %vm362_vm1, %v2004_v24, %v536_v22 }
  0x9d   : > { %1737 = vmatmul.mubr.msk.bf16.vlgmr.msra.gmra.mrb[0].mxu0 %vm696_vm3, %v1549_v37 }
  0x9e   : > { %v542_v41 = vpop.permute.xlu1 %541  ;;  %1745 = vmatpush3.bf16.msra.mxu0 %v2156_v10 }
  0x9f   : > { %v540_v4 = vpop.permute.xlu0 %539  ;;  %1746 = vmatprep.subr.bf16.mxu0 %v1873_v9  ;;  %v586_v54 = vsel %vm362_vm1, %v2013_v34, %v542_v41 }
  0xa0   : > { %v583_v30 = vsel %vm362_vm1, %v2023_v39, %v540_v4  ;;  %v1877_v39 = vld [vmem:[%s2398_s1 + $0xa0] sm:$0xff]  }
  0xa2   : > { %v562_v47 = vpop.permute.xlu1 %561  ;;  %1747 = vmatpush3.bf16.msra.mxu0 %v1873_v9 }
  0xa3   : > { %v602_v49 = vsel %vm387_vm2, %v580_v43, %v562_v47  ;;  %v560_v27 = vpop.permute.xlu0 %559  ;;  %1748 = vmatprep.subr.bf16.mxu0 %v1874_v42 }
  0xa4   : > { %v600_v52 = vsel %vm387_vm2, %v577_v48, %v560_v27 }
  0xa5   : > { %v1532_v53 = vcombine.low %v600_v52, %v602_v49 }
  0xa6   : > { %v566_v18 = vpop.permute.xlu1 %565  ;;  %1749 = vmatpush3.bf16.msra.mxu0 %v1874_v42 }
  0xa7   : > { %v606_v24 = vsel %vm387_vm2, %v586_v54, %v566_v18  ;;  %1712 = vmatprep.mubr.msk.bf16.mxu1 %vm696_vm3, %v1532_v53  ;;  %v564_v57 = vpop.permute.xlu0 %563  ;;  %1750 = vmatprep.subr.bf16.mxu0 %v1875_v50 }
  0xa8   : > { %v604_v60 = vsel %vm387_vm2, %v583_v30, %v564_v57 }
  0xa9   : > { %v1533_v51 = vcombine.low %v604_v60, %v606_v24 }
  0xaa   : > { %v333_v61 = vpop.permute.xlu1 %332  ;;  %1751 = vmatpush3.bf16.msra.mxu0 %v1875_v50 }
  0xab   : > { %1713 = vmatmul.mubr.msk.bf16.vlgmr.msra.gmra.mrb[0].mxu1 %vm696_vm3, %v1533_v51  ;;  %v331_v34 = vpop.permute.xlu0 %330  ;;  %1752 = vmatprep.subr.bf16.mxu0 %v1876_v59  ;;  %v380_v1 = vsel %vm362_vm1, %v2063_v8, %v333_v61 }
  0xac   : > { %1776 = vmatpush3.bf16.msra.mxu1 %v2156_v10  ;;  %v377_v3 = vsel %vm362_vm1, %v2067_v11, %v331_v34 }
  0xad   : > { %1769 = vmatprep.subr.bf16.mxu1 %v1873_v9 }
  0xae   : > { %v337_v56 = vpop.permute.xlu1 %336  ;;  %1753 = vmatpush3.bf16.msra.mxu0 %v1876_v59 }
  0xaf   : > { %v335_v62 = vpop.permute.xlu0 %334  ;;  %1754 = vmatprep.subr.bf16.mxu0 %v1877_v39  ;;  %v386_v8 = vsel %vm362_vm1, %v2078_v17, %v337_v56 }
  0xb0   : > { %1777 = vmatpush3.bf16.msra.mxu1 %v1873_v9  ;;  %v383_v11 = vsel %vm362_vm1, %v2089_v23, %v335_v62 }
  0xb1   : > { %1770 = vmatprep.subr.bf16.mxu1 %v1874_v42 }
  0xb2   : > { %v357_v2 = vpop.permute.xlu1 %356  ;;  %1755 = vmatpush3.bf16.msra.mxu0 %v1877_v39 }
  0xb3   : > { %v399_v10 = vsel %vm387_vm2, %v380_v1, %v357_v2  ;;  %v355_v5 = vpop.permute.xlu0 %354  ;;  %1756 = vmatprep.subr.bf16.mxu0 %v1878_v0 }
  0xb4   : > { %v397_v15 = vsel %vm387_vm2, %v377_v3, %v355_v5  ;;  %1778 = vmatpush3.bf16.msra.mxu1 %v1874_v42 }
  0xb5   : > { %v1550_v44 = vcombine.low %v397_v15, %v399_v10  ;;  %1771 = vmatprep.subr.bf16.mxu1 %v1875_v50 }
  0xb6   : > { %v361_v21 = vpop.permute.xlu1 %360  ;;  %1757 = vmatpush3.bf16.msra.mxu0 %v1878_v0 }
  0xb7   : > { %v403_v58 = vsel %vm387_vm2, %v386_v8, %v361_v21  ;;  %1740 = vmatprep.mubr.msk.bf16.mxu0 %vm696_vm3, %v1550_v44  ;;  %v359_v25 = vpop.permute.xlu0 %358  ;;  %1802 = vmatprep.subr.msk.bf16.mxu0 %vm709_vm0, %v1879_v12 }
  0xb8   : > { %v401_v28 = vsel %vm387_vm2, %v383_v11, %v359_v25  ;;  %1779 = vmatpush3.bf16.msra.mxu1 %v1875_v50 }
  0xb9   : > { %v1551_v31 = vcombine.low %v401_v28, %v403_v58  ;;  %1772 = vmatprep.subr.bf16.mxu1 %v1876_v59 }
  0xba   : > { %v546_v17 = vpop.permute.xlu1 %545  ;;  %1759 = vmatpush3.bf16.msra.mxu0 %v1213_v26 }
  0xbb   : > { %1741 = vmatmul.mubr.msk.bf16.gmra.mrb[4].mxu0 %vm696_vm3, %v1551_v31  ;;  %v544_v36 = vpop.permute.xlu0 %543  ;;  %v592_v13 = vsel %vm362_vm1, %v2105_v32, %v546_v17 }
  0xbc   : > { %1780 = vmatpush3.bf16.msra.mxu1 %v1876_v59  ;;  %v589_v6 = vsel %vm362_vm1, %v2120_v45, %v544_v36 }
  0xbd   : > { %1773 = vmatprep.subr.bf16.mxu1 %v1877_v39 }
  0xbe   : > { %v1042_v23 = vpop.permute.xlu1 %1041 }
  0xbf   : > { %v1040_v33 = vpop.permute.xlu0 %1039  ;;  %v1084_v47 = vsel %vm362_vm1, %v2130_v55, %v1042_v23 }
  0xc0   : > { %1781 = vmatpush3.bf16.msra.mxu1 %v1877_v39  ;;  %v1081_v32 = vsel %vm362_vm1, %v2142_v63, %v1040_v33 }
  0xc1   : > { %1774 = vmatprep.subr.bf16.mxu1 %v1878_v0 }
  0xc2   : > { %v550_v37 = vpop.permute.xlu1 %549 }
  0xc3   : > { %v548_v7 = vpop.permute.xlu0 %547  ;;  %v598_v52 = vsel %vm362_vm1, %v2160_v14, %v550_v37 }
  0xc4   : > { %1782 = vmatpush3.bf16.msra.mxu1 %v1878_v0  ;;  %v595_v54 = vsel %vm362_vm1, %v2167_v19, %v548_v7 }
  0xc5   : > { %1803 = vmatprep.subr.msk.bf16.mxu1 %vm709_vm0, %v1879_v12 }
  0xc6   : > { %v570_v40 = vpop.permute.xlu1 %569 }
  0xc7   : > { %v610_v22 = vsel %vm387_vm2, %v592_v13, %v570_v40  ;;  %v568_v9 = vpop.permute.xlu0 %567 }
  0xc8   : > { %v608_v41 = vsel %vm387_vm2, %v589_v6, %v568_v9  ;;  %1783 = vmatpush3.bf16.msra.mxu1 %v1213_v26 }
  0xc9   : > { %v1534_v4 = vcombine.low %v608_v41, %v610_v22 }
  0xca   : > { %v1046_v42 = vpop.permute.xlu1 %1045 }
  0xcb   : > { %1716 = vmatprep.mubr.msk.bf16.mxu1 %vm696_vm3, %v1534_v4  ;;  %v1044_v43 = vpop.permute.xlu0 %1043  ;;  %v1090_v24 = vsel %vm362_vm1, %v2195_v38, %v1046_v42 }
  0xcc   : > { %v1087_v59 = vsel %vm362_vm1, %v2202_v46, %v1044_v43 }
  0xce   : > { %v1066_v48 = vpop.permute.xlu1 %1065 }
  0xcf   : > { %v1106_v45 = vsel %vm387_vm2, %v1084_v47, %v1066_v48  ;;  %v1064_v49 = vpop.permute.xlu0 %1063 }
  0xd0   : > { %v1104_v27 = vsel %vm387_vm2, %v1081_v32, %v1064_v49 }
  0xd1   : > { %v1603_v50 = vcombine.low %v1104_v27, %v1106_v45 }
  0xd2   : > { %v574_v53 = vpop.permute.xlu1 %573 }
  0xd3   : > { %v614_v18 = vsel %vm387_vm2, %v598_v52, %v574_v53  ;;  %1760 = vmatprep.mubr.msk.bf16.mxu0 %vm696_vm3, %v1603_v50  ;;  %v572_v55 = vpop.permute.xlu0 %571 }
  0xd4   : > { %v612_v63 = vsel %vm387_vm2, %v595_v54, %v572_v55 }
  0xd5   : > { %v1535_v30 = vcombine.low %v612_v63, %v614_v18 }
  0xd6   : > { %v1070_v57 = vpop.permute.xlu1 %1069 }
  0xd7   : > { %v1110_v14 = vsel %vm387_vm2, %v1090_v24, %v1070_v57  ;;  %1717 = vmatmul.mubr.msk.bf16.gmra.mrb[4].mxu1 %vm696_vm3, %v1535_v30  ;;  %v1068_v19 = vpop.permute.xlu0 %1067 }
  0xd8   : > { %v1108_v60 = vsel %vm387_vm2, %v1087_v59, %v1068_v19 }
  0xd9   : > { %v1604_v51 = vcombine.low %v1108_v60, %v1110_v14 }
  0xda   : > { %v1050_v61 = vpop.permute.xlu1 %1049 }
  0xdb   : > { %1761 = vmatmul.mubr.msk.bf16.vlgmr.msra.gmra.mrb[0].mxu0 %vm696_vm3, %v1604_v51  ;;  %v1048_v34 = vpop.permute.xlu0 %1047  ;;  %v1096_v38 = vsel %vm362_vm1, %v2220_v16, %v1050_v61 }
  0xdc   : > { %v1093_v46 = vsel %vm362_vm1, %v2224_v20, %v1048_v34 }
  0xde   : > { %v1054_v39 = vpop.permute.xlu1 %1053 }
  0xdf   : > { %v1052_v56 = vpop.permute.xlu0 %1051  ;;  %v1102_v10 = vsel %vm362_vm1, %v2234_v29, %v1054_v39  ;;  %v1906_v29 = vmov 0.0  }
  0xe0   : > { %v1099_v12 = vsel %vm362_vm1, %v2238_v35, %v1052_v56  ;;  %205 = vst [vmem:[%s2373_s4] sm:$0x3] %v1906_v29 }
  0xe2   : > { %v1074_v62 = vpop.permute.xlu1 %1073 }
  0xe3   : > { %v1114_v0 = vsel %vm387_vm2, %v1096_v38, %v1074_v62  ;;  %v1072_v1 = vpop.permute.xlu0 %1071 }
  0xe4   : > { %v1112_v2 = vsel %vm387_vm2, %v1093_v46, %v1072_v1 }
  0xe5   : > { %v1605_v3 = vcombine.low %v1112_v2, %v1114_v0 }
  0xe6   : > { %v1078_v5 = vpop.permute.xlu1 %1077 }
  0xe7   : > { %v1118_v16 = vsel %vm387_vm2, %v1102_v10, %v1078_v5  ;;  %1764 = vmatprep.mubr.msk.bf16.mxu1 %vm696_vm3, %v1605_v3  ;;  %v1076_v15 = vpop.permute.xlu0 %1075 }
  0xe8   : > { %v1116_v20 = vsel %vm387_vm2, %v1099_v12, %v1076_v15 }
  0xe9   : > { %v1606_v44 = vcombine.low %v1116_v20, %v1118_v16 }
  0xeb   : > { %1765 = vmatmul.mubr.msk.bf16.vlgmr.msra.gmra.mrb[8].mxu1 %vm696_vm3, %v1606_v44 }
 0x17e   : > { %v1714_v35 = vpop.f32.mrb[0].mxu1 }
 0x17f   : > { %v747_v8 = vpop.f32.mrb[1].mxu1 }
 0x180   : > { %v1715_v21 = vpop.f32.mrb[2].mxu1 }
 0x181   : > { %v750_v11 = vpop.f32.mrb[3].mxu1 }
 0x18e   : > { %v1742_v58 = vpop.f32.mrb[4].mxu0 }
 0x18f   : > { %v908_v25 = vpop.f32.mrb[5].mxu0 }
 0x190   : > { %v1743_v26 = vpop.f32.mrb[6].mxu0 }
 0x191   : > { %v911_v28 = vpop.f32.mrb[7].mxu0 }
 0x1aa   : > { %v1718_v31 = vpop.f32.mrb[4].mxu1 }
 0x1ab   : > { %v917_v17 = vadd.f32 %v1742_v58, %v1718_v31  ;;  %v763_v36 = vpop.f32.mrb[5].mxu1  ;;  %v1328_v58 = vld [vmem:[%s2373_s4] sm:$0x3] }
 0x1ac   : > { %v909_v23 = vadd.f32 %v908_v25, %v763_v36  ;;  %v1719_v33 = vpop.f32.mrb[6].mxu1 }
 0x1ad   : > { %v920_v37 = vadd.f32 %v1743_v26, %v1719_v33  ;;  %v766_v7 = vpop.f32.mrb[7].mxu1 }
 0x1ae   : > { %v912_v13 = vadd.f32 %v911_v28, %v766_v7  ;;  %v1762_v40 = vpop.f32.mrb[0].mxu0 }
 0x1af   : > { %v1784_v6 = vadd.f32 %v1762_v40, %v1714_v35  ;;  %v1249_v22 = vpop.f32.mrb[1].mxu0 }
 0x1b0   : > { %v1785_v9 = vadd.f32 %v1249_v22, %v747_v8  ;;  %v1763_v41 = vpop.f32.mrb[2].mxu0 }
 0x1b1   : > { %v1786_v4 = vadd.f32 %v1763_v41, %v1715_v21  ;;  %v1252_v42 = vpop.f32.mrb[3].mxu0  ;;  %v1344_v27 = vmul.f32 %v1784_v6, %v1784_v6 }
 0x1b2   : > { %v1787_v43 = vadd.f32 %v1252_v42, %v750_v11  ;;  %v1342_v48 = vmul.f32 %v1785_v9, %v1785_v9 }
 0x1b3   : > { %v1645_v47 = vpack.c.bf16 %v1786_v4, %v1784_v6  ;;  %v1345_v53 = vmul.f32 %v1786_v4, %v1786_v4 }
 0x1b4   : > { %v1640_v32 = vpack.c.bf16 %v1787_v43, %v1785_v9  ;;  %v1329_v45 = vadd.f32 %v1787_v43, %v1785_v9  ;;  %v1343_v49 = vmul.f32 %v1787_v43, %v1787_v43 }
 0x1b5   : > { %1657 = vst [vmem:[%s2380_s8 + $0x8] sm:$0xff] %v1645_v47  }
 0x1b6   : > { %1641 = vst [vmem:[%s2380_s8] sm:$0xff] %v1640_v32   ;;  %v1330_v50 = vadd.f32 %v1784_v6, %v1329_v45  ;;  %v1350_v52 = vadd.f32 %v1343_v49, %v1342_v48 }
 0x1b8   : > { %v1351_v54 = vadd.f32 %v1350_v52, %v1344_v27  ;;  %v1331_v18 = vadd.f32 %v1786_v4, %v1330_v50 }
 0x1ba   : > { %v1352_v55 = vadd.f32 %v1351_v54, %v1345_v53 }
 0x1be   : > { %v1766_v63 = vpop.f32.mrb[8].mxu1 }
 0x1bf   : > { %v1286_v30 = vadd.f32 %v1766_v63, %v917_v17  ;;  %v1265_v24 = vpop.f32.mrb[9].mxu1 }
 0x1c0   : > { %v1284_v57 = vadd.f32 %v1265_v24, %v909_v23  ;;  %v1767_v59 = vpop.f32.mrb[10].mxu1 }
 0x1c1   : > { %v1287_v14 = vadd.f32 %v1767_v59, %v920_v37  ;;  %v1268_v19 = vpop.f32.mrb[11].mxu1  ;;  %v1348_v46 = vmul.f32 %v1286_v30, %v1286_v30 }
 0x1c2   : > { %v1332_v60 = vadd.f32 %v1331_v18, %v1284_v57  ;;  %v1346_v51 = vmul.f32 %v1284_v57, %v1284_v57  ;;  %v1285_v61 = vadd.f32 %v1268_v19, %v912_v13 }
 0x1c3   : > { %v1655_v34 = vpack.c.bf16 %v1287_v14, %v1286_v30  ;;  %v1349_v2 = vmul.f32 %v1287_v14, %v1287_v14 }
 0x1c4   : > { %v1353_v39 = vadd.f32 %v1352_v55, %v1346_v51  ;;  %v1650_v56 = vpack.c.bf16 %v1285_v61, %v1284_v57  ;;  %v1333_v38 = vadd.f32 %v1332_v60, %v1285_v61  ;;  %v1347_v62 = vmul.f32 %v1285_v61, %v1285_v61 }
 0x1c5   : > { %1659 = vst [vmem:[%s2380_s8 + $0x18] sm:$0xff] %v1655_v34  }
 0x1c6   : > { %1658 = vst [vmem:[%s2380_s8 + $0x10] sm:$0xff] %v1650_v56   ;;  %v1334_v0 = vadd.f32 %v1333_v38, %v1286_v30  ;;  %v1354_v1 = vadd.f32 %v1353_v39, %v1347_v62 }
 0x1c8   : > { %v1335_v3 = vadd.f32 %v1334_v0, %v1287_v14  ;;  %v1355_v10 = vadd.f32 %v1354_v1, %v1348_v46 }
 0x1ca   : > { %v1336_v5 = vrot.slane %v1335_v3, 4  ;;  %v1356_v12 = vadd.f32 %v1355_v10, %v1349_v2 }
 0x1cc   : > { %v1337_v16 = vadd.f32 %v1336_v5, %v1335_v3  ;;  %v1357_v15 = vrot.slane %v1356_v12, 4 }
 0x1ce   : > { %v1338_v20 = vrot.slane %v1337_v16, 2  ;;  %v1358_v44 = vadd.f32 %v1357_v15, %v1356_v12 }
 0x1d0   : > { %v1339_v29 = vadd.f32 %v1338_v20, %v1337_v16  ;;  %v1359_v35 = vrot.slane %v1358_v44, 2 }
 0x1d2   : > { %v1340_v8 = vrot.slane %v1339_v29, 1  ;;  %v1360_v21 = vadd.f32 %v1359_v35, %v1358_v44 }
 0x1d4   : > { %v1361_v11 = vrot.slane %v1360_v21, 1  ;;  %v1341_v25 = vadd.f32 %v1340_v8, %v1339_v29 }
 0x1d6   : > { %v1362_v26 = vadd.f32 %v1361_v11, %v1360_v21 }
 0x1d8   : > { %v1364_v28 = vsel %vm1363_vm4, %v1341_v25, %v1362_v26 }
 0x1d9   : > { %v1365_v31 = vadd.f32 %v1364_v28, %v1328_v58 }
 0x1db   : > { %1366 = vst [vmem:[%s2373_s4] sm:$0x3] %v1365_v31 }
 0x1dc PF: > { %s14_s14 = sadd.s32 1, %s1902_s14   ;;  %s2401_s12 = smov %s1898_s13 }
 0x1dd   : > { %p11_p6 = scmp.ge.s32.totalorder %s14_s14, 4   ;;  %s2402_s13 = smov %s2404_s15 }
 0x1df   :  { %13 = sbr.rel (!%p11_p6) target bundleno = 2 (0x2), region = 79 }

// kernel: unit_conv_forward.3
= control target key start
LH: loop header
LB: loop body
LE: loop exit
PB: predicated region body
PF: predicated region fallthrough
CT: control target
= control target key end

     0   :  { %s455_s0 = inlined_call_operand.vmem [shape: bf16[128,128], index: 0, kind: input, shape index: {}, may-alias: {0,3}]   ;;  %s456_s1 = inlined_call_operand.vmem [shape: f32[1,128], index: 1, kind: input, shape index: {}]   ;;  %s457_s2 = inlined_call_operand.vmem [shape: f32[1,128], index: 2, kind: input, shape index: {}]   ;;  %s458_s3 = inlined_call_operand.vmem [shape: bf16[128,128], index: 3, kind: output, shape index: {}, may-alias: {0,3}]  }
   0x1   :  { %v259_v0 = vld [vmem:[%s455_s0] sm:$0xff]   ;;  %v330_v4 = vld [vmem:[%s455_s0 + $0x8] sm:$0xff]   ;;  %v331_v5 = vld [vmem:[%s455_s0 + $0x10] sm:$0xff]  }
   0x2   :  { %v370_v1 = vld [vmem:[%s456_s1] ss:$0 sm:$0xff]  ;;  %v260_v2 = vunpack.c.l.bf16 %v259_v0  ;;  %v261_v3 = vunpack.c.h.bf16 %v259_v0  ;;  %v332_v6 = vld [vmem:[%s455_s0 + $0x18] sm:$0xff]   ;;  %v264_v8 = vunpack.c.l.bf16 %v330_v4  ;;  %v265_v9 = vunpack.c.h.bf16 %v330_v4  ;;  %v334_v35 = vld [vmem:[%s455_s0 + $0x28] sm:$0xff]  }
   0x3   :  { %v384_v7 = vld [vmem:[%s457_s2] ss:$0 sm:$0xff]  ;;  %v268_v10 = vunpack.c.l.bf16 %v331_v5  ;;  %v269_v11 = vunpack.c.h.bf16 %v331_v5  ;;  %v272_v14 = vunpack.c.l.bf16 %v332_v6  ;;  %v273_v15 = vunpack.c.h.bf16 %v332_v6 }
   0x4   :  { %v53_v12 = vmul.f32 %v260_v2, %v370_v1  ;;  %v54_v13 = vmul.f32 %v261_v3, %v370_v1  ;;  %v55_v16 = vmul.f32 %v264_v8, %v370_v1  ;;  %v56_v17 = vmul.f32 %v265_v9, %v370_v1  ;;  %v333_v34 = vld [vmem:[%s455_s0 + $0x20] sm:$0xff]  }
   0x5   :  { %v57_v18 = vmul.f32 %v268_v10, %v370_v1  ;;  %v58_v19 = vmul.f32 %v269_v11, %v370_v1  ;;  %v59_v22 = vmul.f32 %v272_v14, %v370_v1  ;;  %v60_v23 = vmul.f32 %v273_v15, %v370_v1 }
   0x6   :  { %v76_v20 = vadd.f32 %v384_v7, %v53_v12  ;;  %v77_v21 = vadd.f32 %v384_v7, %v54_v13  ;;  %v78_v24 = vadd.f32 %v384_v7, %v55_v16  ;;  %v79_v25 = vadd.f32 %v384_v7, %v56_v17 }
   0x7   :  { %v80_v26 = vadd.f32 %v384_v7, %v57_v18  ;;  %v81_v27 = vadd.f32 %v384_v7, %v58_v19  ;;  %v82_v42 = vadd.f32 %v384_v7, %v59_v22  ;;  %v83_v43 = vadd.f32 %v384_v7, %v60_v23 }
   0x8   :  { %vm92_vm0 = vcmp.ge.f32.partialorder %v76_v20, 0.0  ;;  %vm93_vm1 = vcmp.ge.f32.partialorder %v77_v21, 0.0  ;;  %v108_v28 = vmul.f32 0.01, %v76_v20  ;;  %v109_v29 = vmul.f32 0.01, %v77_v21 }
   0x9   :  { %vm94_vm2 = vcmp.ge.f32.partialorder %v78_v24, 0.0  ;;  %vm95_vm3 = vcmp.ge.f32.partialorder %v79_v25, 0.0  ;;  %v110_v30 = vmul.f32 0.01, %v78_v24  ;;  %v111_v31 = vmul.f32 0.01, %v79_v25 }
   0xa   :  { %v124_v32 = vsel %vm92_vm0, %v76_v20, %v108_v28  ;;  %v125_v33 = vsel %vm93_vm1, %v77_v21, %v109_v29  ;;  %vm96_vm4 = vcmp.ge.f32.partialorder %v80_v26, 0.0  ;;  %vm97_vm5 = vcmp.ge.f32.partialorder %v81_v27, 0.0 }
   0xb   :  { %v293_v36 = vpack.c.bf16 %v125_v33, %v124_v32  ;;  %v126_v37 = vsel %vm94_vm2, %v78_v24, %v110_v30  ;;  %v127_v38 = vsel %vm95_vm3, %v79_v25, %v111_v31  ;;  %v112_v39 = vmul.f32 0.01, %v80_v26 }
   0xc   :  { %v298_v40 = vpack.c.bf16 %v127_v38, %v126_v37  ;;  %v113_v41 = vmul.f32 0.01, %v81_v27  ;;  %v276_v45 = vunpack.c.l.bf16 %v333_v34  ;;  %v277_v46 = vunpack.c.h.bf16 %v333_v34 }
   0xd   :  { %294 = vst [vmem:[%s458_s3] sm:$0xff] %v293_v36   ;;  %v128_v44 = vsel %vm96_vm4, %v80_v26, %v112_v39  ;;  %v280_v47 = vunpack.c.l.bf16 %v334_v35  ;;  %vm98_vm6 = vcmp.ge.f32.partialorder %v82_v42, 0.0  ;;  %vm99_vm7 = vcmp.ge.f32.partialorder %v83_v43, 0.0 }
   0xe   :  { %v129_v49 = vsel %vm97_vm5, %v81_v27, %v113_v41  ;;  %v114_v50 = vmul.f32 0.01, %v82_v42  ;;  %v115_v52 = vmul.f32 0.01, %v83_v43  ;;  %v61_v53 = vmul.f32 %v276_v45, %v370_v1 }
   0xf   :  { %v303_v51 = vpack.c.bf16 %v129_v49, %v128_v44  ;;  %v62_v54 = vmul.f32 %v277_v46, %v370_v1  ;;  %v281_v56 = vunpack.c.h.bf16 %v334_v35  ;;  %v63_v57 = vmul.f32 %v280_v47, %v370_v1 }
  0x10   :  { %v130_v55 = vsel %vm98_vm6, %v82_v42, %v114_v50  ;;  %v131_v59 = vsel %vm99_vm7, %v83_v43, %v115_v52  ;;  %v84_v60 = vadd.f32 %v384_v7, %v61_v53 }
  0x11   :  { %v85_v61 = vadd.f32 %v384_v7, %v62_v54  ;;  %v308_v63 = vpack.c.bf16 %v131_v59, %v130_v55  ;;  %v64_v0 = vmul.f32 %v281_v56, %v370_v1  ;;  %v86_v2 = vadd.f32 %v384_v7, %v63_v57 }
  0x12   :  { %vm100_vm8 = vcmp.ge.f32.partialorder %v84_v60, 0.0  ;;  %v116_v5 = vmul.f32 0.01, %v84_v60 }
  0x13   :  { %vm101_vm9 = vcmp.ge.f32.partialorder %v85_v61, 0.0  ;;  %v117_v6 = vmul.f32 0.01, %v85_v61  ;;  %v87_v8 = vadd.f32 %v384_v7, %v64_v0  ;;  %vm102_vm10 = vcmp.ge.f32.partialorder %v86_v2, 0.0 }
  0x14   :  { %v335_v48 = vld [vmem:[%s455_s0 + $0x30] sm:$0xff]   ;;  %v118_v9 = vmul.f32 0.01, %v86_v2  ;;  %v132_v11 = vsel %vm100_vm8, %v84_v60, %v116_v5 }
  0x15   :  { %337 = vst [vmem:[%s458_s3 + $0x8] sm:$0xff] %v298_v40   ;;  %v284_v58 = vunpack.c.l.bf16 %v335_v48  ;;  %338 = vst [vmem:[%s458_s3 + $0x10] sm:$0xff] %v303_v51   ;;  %v285_v62 = vunpack.c.h.bf16 %v335_v48  ;;  %v133_v12 = vsel %vm101_vm9, %v85_v61, %v117_v6  ;;  %vm103_vm11 = vcmp.ge.f32.partialorder %v87_v8, 0.0 }
  0x16   :  { %v313_v15 = vpack.c.bf16 %v133_v12, %v132_v11  ;;  %v119_v16 = vmul.f32 0.01, %v87_v8  ;;  %v134_v17 = vsel %vm102_vm10, %v86_v2, %v118_v9 }
  0x17   :  { %v65_v3 = vmul.f32 %v284_v58, %v370_v1  ;;  %v66_v10 = vmul.f32 %v285_v62, %v370_v1 }
  0x18   :  { %v135_v21 = vsel %vm103_vm11, %v87_v8, %v119_v16 }
  0x19   :  { %v88_v13 = vadd.f32 %v384_v7, %v65_v3  ;;  %v89_v18 = vadd.f32 %v384_v7, %v66_v10  ;;  %v318_v23 = vpack.c.bf16 %v135_v21, %v134_v17 }
  0x1b   :  { %vm104_vm12 = vcmp.ge.f32.partialorder %v88_v13, 0.0  ;;  %v120_v19 = vmul.f32 0.01, %v88_v13  ;;  %vm105_vm13 = vcmp.ge.f32.partialorder %v89_v18, 0.0  ;;  %v121_v24 = vmul.f32 0.01, %v89_v18 }
  0x1c   :  { %v336_v4 = vld [vmem:[%s455_s0 + $0x38] sm:$0xff]  }
  0x1d   :  { %339 = vst [vmem:[%s458_s3 + $0x18] sm:$0xff] %v308_v63   ;;  %v288_v14 = vunpack.c.l.bf16 %v336_v4  ;;  %v289_v20 = vunpack.c.h.bf16 %v336_v4  ;;  %340 = vst [vmem:[%s458_s3 + $0x20] sm:$0xff] %v313_v15   ;;  %v136_v25 = vsel %vm104_vm12, %v88_v13, %v120_v19  ;;  %v137_v28 = vsel %vm105_vm13, %v89_v18, %v121_v24 }
  0x1e   :  { %341 = vst [vmem:[%s458_s3 + $0x28] sm:$0xff] %v318_v23   ;;  %v323_v29 = vpack.c.bf16 %v137_v28, %v136_v25 }
  0x1f   :  { %v67_v22 = vmul.f32 %v288_v14, %v370_v1  ;;  %v68_v26 = vmul.f32 %v289_v20, %v370_v1 }
  0x20   :  { %342 = vst [vmem:[%s458_s3 + $0x30] sm:$0xff] %v323_v29  }
  0x21   :  { %v90_v27 = vadd.f32 %v384_v7, %v67_v22  ;;  %v91_v30 = vadd.f32 %v384_v7, %v68_v26 }
  0x23   :  { %vm106_vm14 = vcmp.ge.f32.partialorder %v90_v27, 0.0  ;;  %v122_v31 = vmul.f32 0.01, %v90_v27  ;;  %vm107_vm15 = vcmp.ge.f32.partialorder %v91_v30, 0.0  ;;  %v123_v32 = vmul.f32 0.01, %v91_v30 }
  0x25   :  { %v138_v33 = vsel %vm106_vm14, %v90_v27, %v122_v31  ;;  %v139_v1 = vsel %vm107_vm15, %v91_v30, %v123_v32 }
  0x26   :  { %v328_v34 = vpack.c.bf16 %v139_v1, %v138_v33 }
  0x28   :  { %343 = vst [vmem:[%s458_s3 + $0x38] sm:$0xff] %v328_v34  }

</bundles_post_ra>
